<compile_context>
chip_gen: v7x
topology: tpu7x:2x2x1
jax: 0.10.0
libtpu: 0.0.40
codegen_flags: <defaults>
</compile_context>

<pallas_src>
import functools
import math

import jax
import jax.numpy as jnp
from jax import lax
from jax.experimental import pallas as pl
from jax.experimental.pallas import tpu as pltpu

LN_EPS = 1e-5          # PyTorch nn.LayerNorm default
_LANES = 128           # TPU vreg lane width
_MAX_FOLD_WIDTH = 512  # cap on folded lane width so the MXU reduction stays cheap


def _round_up(x, m):
    return ((x + m - 1) // m) * m


@functools.lru_cache(maxsize=None)
def _vmem_params():
    """(per-tile VMEM budget, vmem_limit_bytes) — generation aware."""
    cap = None
    try:
        cap = int(getattr(pltpu.get_tpu_info(), "vmem_capacity_bytes", 0)) or None
    except Exception:          # query unavailable -> conservative numbers
        cap = None
    if cap is not None and cap >= 128 * 1024 * 1024:
        # v5e / v6e: 128 MiB physical VMEM -> roomier tiles, 64 MiB scoped limit.
        return 28 * 1024 * 1024, 64 * 1024 * 1024
    # v7x (64 MiB physical VMEM) or unknown: numbers safe on every generation.
    return 12 * 1024 * 1024, 32 * 1024 * 1024


def _fold_factor(d, rows):
    """(g, width): fold g logical rows into one width-lane physical row with
    width = lcm(d, 128), so loads/stores are lane-dense.  g == 1 => no fold."""
    lcm = d * _LANES // math.gcd(d, _LANES)
    g = lcm // d
    if g <= 1 or lcm > _MAX_FOLD_WIDTH or rows % g != 0:
        return 1, d
    return g, lcm


def _choose_tile_rows(n_rows, width, itemsize, budget, min_pack=8):
    """Largest row tile (multiple of the sublane pack) whose double-buffered
    in/out blocks plus f32/bf16 temporaries fit `budget`, preferring an even
    grid-step count so v7x's two TensorCores stay balanced."""
    pack = max(min_pack, 8 * max(1, 4 // itemsize))
    # Per row: in + out blocks, double-buffered, in the I/O dtype, plus the
    # kernel-internal f32/bf16 temporaries (x, hi/lo, mean, centered, var, y).
    per_row = 4 * width * itemsize + 24 * width
    cap = min(1024, max(pack, budget // per_row))
    cap = max(pack, (cap // pack) * pack)
    n_pad = _round_up(n_rows, pack)
    if n_pad <= cap:
        # Whole input fits one step; if it is big enough, split into two equal
        # steps so both v7x TCs get work (negligible cost on the 1-TC chips).
        if n_pad >= 2 * pack:
            return max(pack, _round_up(-(-n_rows // 2), pack))
        return n_pad
    # Multi-step: largest tile <= cap giving an EVEN step count; don't shrink
    # below cap // 2 just for evenness.
    t = cap
    while t >= max(pack, cap // 2):
        if (-(-n_rows // t)) % 2 == 0:
            return t
        t -= pack
    return cap


def _layernorm_kernel(x_ref, w_ref, b_ref, o_ref):
    """LayerNorm over the full last axis of a (tile_rows, D) block
    (wide or awkward D); cross-lane mean/var on the XLU."""
    x = x_ref[...].astype(jnp.float32)
    mean = jnp.mean(x, axis=-1, keepdims=True)
    c = x - mean
    var = jnp.mean(c * c, axis=-1, keepdims=True)
    y = (c * lax.rsqrt(var + LN_EPS) * w_ref[...].astype(jnp.float32)
         + b_ref[...].astype(jnp.float32))
    o_ref[...] = y.astype(o_ref.dtype)


def _layernorm_folded_kernel(x_ref, s_ref, w_ref, b_ref, o_ref, *, inv_d):
    """LayerNorm where g = width // d logical rows are folded into each
    width-lane physical row (lane-dense I/O for small / odd feature dims).

    Per-segment sums are x @ S with S the constant (width, width)
    block-diagonal 0/1 matrix (s_ref, bf16).  The operand is split into bf16
    hi/lo parts so every MXU product is exact (multiplication by exactly 0/1)
    and accumulation is f32 -> numerics match the f32 reference to ~1e-6
    without depending on f32-matmul precision settings, while the whole
    reduction lives on the otherwise-idle MXU instead of the XLU.
    """
    x = x_ref[...].astype(jnp.float32)
    s = s_ref[...]

    def seg_mean(v):
        hi = v.astype(jnp.bfloat16)
        lo = (v - hi.astype(jnp.float32)).astype(jnp.bfloat16)
        tot = jnp.dot(hi, s, preferred_element_type=jnp.float32)
        tot = tot + jnp.dot(lo, s, preferred_element_type=jnp.float32)
        return tot * inv_d

    mean = seg_mean(x)
    c = x - mean
    var = seg_mean(c * c)
    y = (c * lax.rsqrt(var + LN_EPS) * w_ref[...].astype(jnp.float32)
         + b_ref[...].astype(jnp.float32))
    o_ref[...] = y.astype(o_ref.dtype)


def layernorm(x, weight, bias):
    """LayerNorm over the last dim of x (any leading shape), elementwise affine."""
    orig_shape = x.shape
    d = orig_shape[-1]
    x2 = x.reshape(-1, d)                  # contiguous reshape: no HBM copy
    rows = x2.shape[0]
    itemsize = jnp.dtype(x.dtype).itemsize
    budget, vmem_limit = _vmem_params()

    g, width = _fold_factor(d, rows)
    if g > 1:
        # Lane-dense path: fold g logical rows into one width-lane physical row.
        n_rows = rows // g
        x_in = x2.reshape(n_rows, width)   # contiguous reshape: no HBM copy
        w_in = jnp.tile(weight.reshape(-1), g).reshape(1, width)
        b_in = jnp.tile(bias.reshape(-1), g).reshape(1, width)
        seg = jnp.arange(width, dtype=jnp.int32) // d
        s_mat = (seg[:, None] == seg[None, :]).astype(jnp.bfloat16)  # block-diag 0/1
        kernel = functools.partial(_layernorm_folded_kernel, inv_d=1.0 / d)
        extra_args = (s_mat,)
        extra_specs = [pl.BlockSpec((width, width), lambda i: (0, 0))]
        min_pack = 16                      # align the bf16 hi/lo matmul operands
    else:
        n_rows, width = rows, d
        x_in = x2
        w_in = weight.reshape(1, d)
        b_in = bias.reshape(1, d)
        kernel = _layernorm_kernel
        extra_args = ()
        extra_specs = []
        min_pack = 8

    tile_rows = _choose_tile_rows(n_rows, width, itemsize, budget, min_pack)
    # Partial last block is masked by Pallas; rows are independent, so no
    # host-side pad/concat/slice is needed.
    grid = (pl.cdiv(n_rows, tile_rows),)

    out = pl.pallas_call(
        kernel,
        out_shape=jax.ShapeDtypeStruct((n_rows, width), x.dtype),
        grid_spec=pltpu.PrefetchScalarGridSpec(
            num_scalar_prefetch=0,
            grid=grid,
            in_specs=[pl.BlockSpec((tile_rows, width), lambda i: (i, 0))]
                     + extra_specs
                     + [pl.BlockSpec((1, width), lambda i: (0, 0)),
                        pl.BlockSpec((1, width), lambda i: (0, 0))],
            out_specs=pl.BlockSpec((tile_rows, width), lambda i: (i, 0)),
        ),
        compiler_params=pltpu.CompilerParams(
            dimension_semantics=("parallel",),   # row axis shards over v7x's 2 TCs
            vmem_limit_bytes=vmem_limit,
        ),
    )(x_in, *extra_args, w_in, b_in)

    return out.reshape(orig_shape)


class PreNorm:
    """JAX/Pallas port of the PyTorch PreNorm module (forward only)."""

    def __init__(self, dim, fn, context_dim=None, *, key=None):
        self.fn = fn
        key = jax.random.PRNGKey(0) if key is None else key
        k1, k2, k3, k4 = jax.random.split(key, 4)
        # Deterministic, non-trivial affine params (PyTorch initializes to
        # ones/zeros; non-trivial values exercise the affine path).
        self.norm_w = 1.0 + 0.1 * jax.random.normal(k1, (dim,), jnp.float32)
        self.norm_b = 0.1 * jax.random.normal(k2, (dim,), jnp.float32)
        if context_dim is not None:
            self.ctx_w = 1.0 + 0.1 * jax.random.normal(k3, (context_dim,), jnp.float32)
            self.ctx_b = 0.1 * jax.random.normal(k4, (context_dim,), jnp.float32)
        else:
            self.ctx_w = None
            self.ctx_b = None

    def __call__(self, x, **kwargs):
        # TODO(synk): when `fn` is a known Linear/QKV projection, fuse it into
        # the LayerNorm kernel as an MXU epilogue (or emit a bf16 normalized
        # output for bf16 consumers) to kill the extra HBM round trip — the
        # largest remaining lever for this mem-bound pair.
        x = layernorm(x, self.norm_w, self.norm_b)
        if self.ctx_w is not None:
            context = kwargs["context"]
            kwargs.update(context=layernorm(context, self.ctx_w, self.ctx_b))
        return self.fn(x, **kwargs)


def _reference_layernorm(x, w, b):
    x32 = x.astype(jnp.float32)
    mean = jnp.mean(x32, axis=-1, keepdims=True)
    var = jnp.mean((x32 - mean) ** 2, axis=-1, keepdims=True)
    return ((x32 - mean) * lax.rsqrt(var + LN_EPS) * w + b).astype(x.dtype)


if __name__ == "__main__":
    B, S, D, DC = 2, 8, 32, 16
    key = jax.random.PRNGKey(0)
    kx, kc, kwx, kwc, kmod = jax.random.split(key, 5)

    x = jax.random.normal(kx, (B, S, D), jnp.float32)
    context = jax.random.normal(kc, (B, S, DC), jnp.float32)

    # Stand-in for the wrapped `fn` (arbitrary user module): a small linear
    # fusion of normed x and normed context, applied as plain JAX glue.
    # HIGHEST precision so the end-to-end check is not polluted by TPU's
    # default bf16-pass f32 matmul (both paths go through the same fn).
    Wx = 0.05 * jax.random.normal(kwx, (D, D), jnp.float32)
    Wc = 0.05 * jax.random.normal(kwc, (DC, D), jnp.float32)

    def fn(x_normed, context=None):
        return (jnp.dot(x_normed, Wx, precision=lax.Precision.HIGHEST)
                + jnp.dot(context, Wc, precision=lax.Precision.HIGHEST))

    module = PreNorm(D, fn, context_dim=DC, key=kmod)
    out = jax.block_until_ready(module(x, context=context))

    ref = fn(_reference_layernorm(x, module.norm_w, module.norm_b),
             context=_reference_layernorm(context, module.ctx_w, module.ctx_b))
    assert out.shape == (B, S, D)
    assert jnp.allclose(out, ref, atol=1e-5, rtol=1e-5), "PreNorm mismatch vs reference"

    # Exercise every kernel path directly against the f32 reference:
    #   (2,8,32)  folded, width 128 (128 % D == 0)
    #   (2,8,16)  folded, width 128
    #   (2,8,96)  folded, width lcm(96,128)=384 (D does not divide 128)
    #   (3,4,256) generic wide path with a partial last row block
    #   (2,7,33)  generic small/odd-D fallback (masked lanes)
    for shape in [(2, 8, 32), (2, 8, 16), (2, 8, 96), (3, 4, 256), (2, 7, 33)]:
        dt = shape[-1]
        kk = jax.random.fold_in(key, dt)
        xt = jax.random.normal(kk, shape, jnp.float32)
        wt = 1.0 + 0.1 * jax.random.normal(jax.random.fold_in(kk, 1), (dt,), jnp.float32)
        bt = 0.1 * jax.random.normal(jax.random.fold_in(kk, 2), (dt,), jnp.float32)
        yt = jax.block_until_ready(layernorm(xt, wt, bt))
        rt = _reference_layernorm(xt, wt, bt)
        assert jnp.allclose(yt, rt, atol=1e-5, rtol=1e-5), f"LayerNorm mismatch for {shape}"

    print("KERNEL_OK")
</pallas_src>

<mosaic_0001>
module attributes {stable_mosaic.version = 11 : i64} {
  func.func @_layernorm_folded_kernel(%arg0: i32, %arg1: memref<16x128xf32, #tpu.memory_space<vmem>>, %arg2: memref<128x128xbf16, #tpu.memory_space<vmem>>, %arg3: memref<1x128xf32, #tpu.memory_space<vmem>>, %arg4: memref<1x128xf32, #tpu.memory_space<vmem>>, %arg5: memref<16x128xf32, #tpu.memory_space<vmem>>) attributes {dimension_semantics = [#tpu.dimension_semantics<parallel>], iteration_bounds = array<i64: 1>, scalar_prefetch = 0 : i64, scratch_operands = 0 : i64, tpu.core_type = #tpu.core_type<tc>, window_params = [{transform_indices = @transform_0, window_bounds = array<i64: 16, 128>}, {pipeline_mode = #tpu.pipeline_mode<synchronous>, transform_indices = @transform_1, window_bounds = array<i64: 128, 128>}, {pipeline_mode = #tpu.pipeline_mode<synchronous>, transform_indices = @transform_2, window_bounds = array<i64: 1, 128>}, {pipeline_mode = #tpu.pipeline_mode<synchronous>, transform_indices = @transform_3, window_bounds = array<i64: 1, 128>}, {transform_indices = @transform_4, window_bounds = array<i64: 16, 128>}]} {
    %c0 = arith.constant 0 : index
    %c0_0 = arith.constant 0 : index
    %0 = vector.load %arg1[%c0, %c0_0] : memref<16x128xf32, #tpu.memory_space<vmem>>, vector<16x128xf32>
    %c0_1 = arith.constant 0 : index
    %c0_2 = arith.constant 0 : index
    %1 = vector.load %arg2[%c0_1, %c0_2] : memref<128x128xbf16, #tpu.memory_space<vmem>>, vector<128x128xbf16>
    %2 = arith.truncf %0 : vector<16x128xf32> to vector<16x128xbf16>
    %3 = arith.extf %2 : vector<16x128xbf16> to vector<16x128xf32>
    %4 = arith.subf %0, %3 : vector<16x128xf32>
    %5 = arith.truncf %4 : vector<16x128xf32> to vector<16x128xbf16>
    %cst = arith.constant dense<0.000000e+00> : vector<16x128xf32>
    %6 = tpu.matmul %2, %1, %cst {dimension_numbers = #tpu.dot_dimension_numbers<[1], [0], [0], [1], [0, 0, 1, 1], [], []>} : vector<16x128xbf16>, vector<128x128xbf16>, vector<16x128xf32> -> vector<16x128xf32>
    %cst_3 = arith.constant dense<0.000000e+00> : vector<16x128xf32>
    %7 = tpu.matmul %5, %1, %cst_3 {dimension_numbers = #tpu.dot_dimension_numbers<[1], [0], [0], [1], [0, 0, 1, 1], [], []>} : vector<16x128xbf16>, vector<128x128xbf16>, vector<16x128xf32> -> vector<16x128xf32>
    %8 = arith.addf %6, %7 : vector<16x128xf32>
    %cst_4 = arith.constant 3.125000e-02 : f32
    %9 = vector.broadcast %cst_4 : f32 to vector<16x128xf32>
    %10 = arith.mulf %8, %9 : vector<16x128xf32>
    %11 = arith.subf %0, %10 : vector<16x128xf32>
    %12 = arith.mulf %11, %11 : vector<16x128xf32>
    %13 = arith.truncf %12 : vector<16x128xf32> to vector<16x128xbf16>
    %14 = arith.extf %13 : vector<16x128xbf16> to vector<16x128xf32>
    %15 = arith.subf %12, %14 : vector<16x128xf32>
    %16 = arith.truncf %15 : vector<16x128xf32> to vector<16x128xbf16>
    %cst_5 = arith.constant dense<0.000000e+00> : vector<16x128xf32>
    %17 = tpu.matmul %13, %1, %cst_5 {dimension_numbers = #tpu.dot_dimension_numbers<[1], [0], [0], [1], [0, 0, 1, 1], [], []>} : vector<16x128xbf16>, vector<128x128xbf16>, vector<16x128xf32> -> vector<16x128xf32>
    %cst_6 = arith.constant dense<0.000000e+00> : vector<16x128xf32>
    %18 = tpu.matmul %16, %1, %cst_6 {dimension_numbers = #tpu.dot_dimension_numbers<[1], [0], [0], [1], [0, 0, 1, 1], [], []>} : vector<16x128xbf16>, vector<128x128xbf16>, vector<16x128xf32> -> vector<16x128xf32>
    %19 = arith.addf %17, %18 : vector<16x128xf32>
    %cst_7 = arith.constant 3.125000e-02 : f32
    %20 = vector.broadcast %cst_7 : f32 to vector<16x128xf32>
    %21 = arith.mulf %19, %20 : vector<16x128xf32>
    %cst_8 = arith.constant 9.99999974E-6 : f32
    %22 = vector.broadcast %cst_8 : f32 to vector<16x128xf32>
    %23 = arith.addf %21, %22 : vector<16x128xf32>
    %24 = math.rsqrt %23 : vector<16x128xf32>
    %25 = arith.mulf %11, %24 : vector<16x128xf32>
    %c0_9 = arith.constant 0 : index
    %c0_10 = arith.constant 0 : index
    %26 = vector.load %arg3[%c0_9, %c0_10] : memref<1x128xf32, #tpu.memory_space<vmem>>, vector<1x128xf32>
    %27 = vector.broadcast %26 : vector<1x128xf32> to vector<16x128xf32>
    %28 = arith.mulf %25, %27 : vector<16x128xf32>
    %c0_11 = arith.constant 0 : index
    %c0_12 = arith.constant 0 : index
    %29 = vector.load %arg4[%c0_11, %c0_12] : memref<1x128xf32, #tpu.memory_space<vmem>>, vector<1x128xf32>
    %30 = vector.broadcast %29 : vector<1x128xf32> to vector<16x128xf32>
    %31 = arith.addf %28, %30 : vector<16x128xf32>
    %c0_13 = arith.constant 0 : index
    %c0_14 = arith.constant 0 : index
    %32 = vector.load %arg5[%c0_13, %c0_14] : memref<16x128xf32, #tpu.memory_space<vmem>>, vector<16x128xf32>
    tpu.vector_store %arg5[%c0_13, %c0_14], %31 {strides = array<i32>} : memref<16x128xf32, #tpu.memory_space<vmem>>, vector<16x128xf32>,
    return
  }
  func.func @transform_0(%arg0: i32) -> (i32, i32) {
    %c0_i32 = arith.constant 0 : i32
    %c0_i32_0 = arith.constant 0 : i32
    return %arg0, %c0_i32 : i32, i32
  }
  func.func @transform_1(%arg0: i32) -> (i32, i32) {
    %c0_i32 = arith.constant 0 : i32
    %c0_i32_0 = arith.constant 0 : i32
    %c0_i32_1 = arith.constant 0 : i32
    return %c0_i32, %c0_i32_0 : i32, i32
  }
  func.func @transform_2(%arg0: i32) -> (i32, i32) {
    %c0_i32 = arith.constant 0 : i32
    %c0_i32_0 = arith.constant 0 : i32
    %c0_i32_1 = arith.constant 0 : i32
    return %c0_i32, %c0_i32_0 : i32, i32
  }
  func.func @transform_3(%arg0: i32) -> (i32, i32) {
    %c0_i32 = arith.constant 0 : i32
    %c0_i32_0 = arith.constant 0 : i32
    %c0_i32_1 = arith.constant 0 : i32
    return %c0_i32, %c0_i32_0 : i32, i32
  }
  func.func @transform_4(%arg0: i32) -> (i32, i32) {
    %c0_i32 = arith.constant 0 : i32
    %c0_i32_0 = arith.constant 0 : i32
    return %arg0, %c0_i32 : i32, i32
  }
}

</mosaic_0001>

<bundles_post_ra>
// kernel: tpu_custom_call.1
= control target key start
LH: loop header
LB: loop body
LE: loop exit
PB: predicated region body
PF: predicated region fallthrough
CT: control target
= control target key end

     0   :  { %9 = vsyncpa [#allocation3], 0  ;;  %s731_s0 = inlined_call_operand.hbm [shape: f32[4,128], index: 0, kind: input, shape index: {}]   ;;  %s732_s1 = inlined_call_operand.hbm [shape: bf16[128,128], index: 1, kind: input, shape index: {}]   ;;  %s733_s2 = inlined_call_operand.vmem [shape: f32[1,128], index: 2, kind: input, shape index: {}]   ;;  %s734_s3 = inlined_call_operand.vmem [shape: f32[1,128], index: 3, kind: input, shape index: {}]   ;;  %s735_s4 = inlined_call_operand.hbm [shape: f32[4,128], index: 4, kind: output, shape index: {}]  }
   0x1   :  { %10 = vsyncpa [#allocation6], 0 }
   0x2   :  { %11 = vsyncpa [#allocation4], 0 }
   0x3   :  { %16 = vsyncadd [#allocation3], 192  ;;  %s566_s15 = smov [#allocation2]   ;;  %s494_s19 = scalar_lea.hbm %s731_s0, 64 }
   0x4   :  { %s17_s16 = sshll.u32 %s566_s15, 4  ;;  %p495_p0 = scmp.ne.s32.totalorder %s731_s0, %s494_s19  ;;  %s18_s16 = int_to_ptr.vmem [resolvable:$true] %s17_s16 }
   0x5   :  { %p498_p1 = scmp.lt.u32.totalorder %s494_s19, %s731_s0 }
   0x7   :  { %p500_p2 = pnand %p498_p1, %p495_p0 }
   0x9   :  { %503 = shalt.err (!%p500_p2)
}
   0xa   :  { %s504_s24 = scalar_lea.vmem %s18_s16, 64  ;;  %s508_s25 = scalar_lea.vmem %s18_s16, 256 }
   0xb   :  { %p505_p3 = scmp.ne.s32.totalorder %s18_s16, %s504_s24  ;;  %p509_p4 = scmp.lt.s32.totalorder %s18_s16, %s18_s16 }
   0xc   :  { %p510_p5 = scmp.lt.s32.totalorder %s508_s25, %s504_s24 }
   0xe   :  { %p511_p6 = por %p510_p5, %p509_p4 }
  0x10   :  { %p512_p7 = pnand %p511_p6, %p505_p3 }
  0x12   :  { %515 = shalt.err (!%p512_p7)
}
  0x13   :  { %s567_s26 = smov 64   ;;  %s568_s27 = smov 4  }
  0x14   :  { %23 = dma.hbm_to_vmem [thread:$0]  %s731_s0, 64, %s18_s16, [#allocation3], %s567_s26, %s567_s26, %s568_s27  }
  0x15   :  { %s569_s30 = smov [#allocation5]   ;;  %s516_s8 = scalar_lea.hbm %s732_s1, 1024 }
  0x16   :  { %s29_s5 = sshll.u32 %s569_s30, 4  ;;  %p517_p8 = scmp.ne.s32.totalorder %s732_s1, %s516_s8  ;;  %s30_s5 = int_to_ptr.vmem [resolvable:$true] %s29_s5 }
  0x17   :  { %p520_p9 = scmp.lt.u32.totalorder %s516_s8, %s732_s1 }
  0x19   :  { %p522_p10 = pnand %p520_p9, %p517_p8 }
  0x1b   :  { %525 = shalt.err (!%p522_p10)
}
  0x1c   :  { %s526_s13 = scalar_lea.vmem %s30_s5, 1024  ;;  %p531_p12 = scmp.lt.s32.totalorder %s30_s5, %s30_s5 }
  0x1d   :  { %p527_p11 = scmp.ne.s32.totalorder %s30_s5, %s526_s13  ;;  %p532_p13 = scmp.lt.s32.totalorder %s526_s13, %s526_s13 }
  0x1f   :  { %p533_p0 = por %p532_p13, %p531_p12 }
  0x21   :  { %p534_p1 = pnand %p533_p0, %p527_p11 }
  0x23   :  { %537 = shalt.err (!%p534_p1)
}
  0x24   :  { %35 = dma.hbm_to_vmem [thread:$0]  %s732_s1, 1024, %s30_s5, [#allocation6], %s567_s26, %s567_s26, %s568_s27  }
  0x25   :  { %560 = dma.done.wait [#allocation3], 256  }
  0x26   :  { %561 = vsyncadd [#allocation3], 4294967040 }
  0x27   :  { %562 = dma.done.wait [#allocation6], 1024  }
  0x28   :  { %563 = vsyncadd [#allocation6], 4294966272  ;;  %v570_v0 = vmov 0.0   ;;  %vm571_vm0 = vmmov 0   ;;  %v634_v1 = vld [vmem:[#allocation5] sm:$0xff]   ;;  %v637_v2 = vld [vmem:[#allocation5 + $0x8] sm:$0xff]  }
  0x29   :  { %387 = vmatprep.subr.bf16.mxu0 %v570_v0  ;;  %403 = vmatprep.mubr.msk.bf16.mxu0 %vm571_vm0, %v570_v0  ;;  %v643_v3 = vld [vmem:[#allocation5 + $0x10] sm:$0xff]   ;;  %v649_v4 = vld [vmem:[#allocation5 + $0x18] sm:$0xff]   ;;  %v655_v5 = vld [vmem:[#allocation5 + $0x20] sm:$0xff]  }
  0x2a   :  { %427 = vmatprep.subr.bf16.mxu1 %v570_v0  ;;  %443 = vmatprep.mubr.msk.bf16.mxu1 %vm571_vm0, %v570_v0  ;;  %v47_v6 = vld [vmem:[#allocation2] sm:$0xff]  ;;  %v48_v7 = vld [vmem:[#allocation2 + $0x8] sm:$0xff]  ;;  %v661_v9 = vld [vmem:[#allocation5 + $0x28] sm:$0xff]  }
  0x2b   :  { %388 = vmatpush3.bf16.msra.mxu0 %v634_v1  ;;  %428 = vmatpush3.bf16.msra.mxu1 %v634_v1  ;;  %v65_v8 = vpack.c.bf16 %v48_v7, %v47_v6  ;;  %v667_v12 = vld [vmem:[#allocation5 + $0x30] sm:$0xff]   ;;  %v489_v15 = vld [vmem:[#allocation5 + $0x38] sm:$0xff]  }
  0x2c   :  { %389 = vmatprep.subr.bf16.mxu0 %v570_v0  ;;  %429 = vmatprep.subr.bf16.mxu1 %v570_v0  ;;  %v349_v42 = vld [vmem:[%s733_s2] ss:$0 sm:$0xff] }
  0x2d   :  { %v66_v10 = vunpack.c.l.bf16 %v65_v8  ;;  %v67_v11 = vunpack.c.h.bf16 %v65_v8  ;;  %v350_v45 = vld [vmem:[%s734_s3] ss:$0 sm:$0xff] }
  0x2f   :  { %390 = vmatpush3.bf16.msra.mxu0 %v637_v2  ;;  %430 = vmatpush3.bf16.msra.mxu1 %v637_v2  ;;  %v68_v13 = vsub.f32 %v47_v6, %v66_v10  ;;  %v69_v14 = vsub.f32 %v48_v7, %v67_v11 }
  0x30   :  { %391 = vmatprep.subr.bf16.mxu0 %v570_v0  ;;  %431 = vmatprep.subr.bf16.mxu1 %v570_v0 }
  0x31   :  { %v70_v16 = vpack.c.bf16 %v69_v14, %v68_v13 }
  0x33   :  { %392 = vmatpush3.bf16.msra.mxu0 %v643_v3  ;;  %432 = vmatpush3.bf16.msra.mxu1 %v643_v3 }
  0x34   :  { %393 = vmatprep.subr.bf16.mxu0 %v570_v0  ;;  %433 = vmatprep.subr.bf16.mxu1 %v570_v0 }
  0x37   :  { %394 = vmatpush3.bf16.msra.mxu0 %v649_v4  ;;  %434 = vmatpush3.bf16.msra.mxu1 %v649_v4 }
  0x38   :  { %395 = vmatprep.subr.bf16.mxu0 %v570_v0  ;;  %435 = vmatprep.subr.bf16.mxu1 %v570_v0 }
  0x3b   :  { %396 = vmatpush3.bf16.msra.mxu0 %v655_v5  ;;  %436 = vmatpush3.bf16.msra.mxu1 %v655_v5 }
  0x3c   :  { %397 = vmatprep.subr.bf16.mxu0 %v570_v0  ;;  %437 = vmatprep.subr.bf16.mxu1 %v570_v0 }
  0x3f   :  { %398 = vmatpush3.bf16.msra.mxu0 %v661_v9  ;;  %438 = vmatpush3.bf16.msra.mxu1 %v661_v9 }
  0x40   :  { %399 = vmatprep.subr.bf16.mxu0 %v570_v0  ;;  %439 = vmatprep.subr.bf16.mxu1 %v570_v0 }
  0x43   :  { %400 = vmatpush3.bf16.msra.mxu0 %v667_v12  ;;  %440 = vmatpush3.bf16.msra.mxu1 %v667_v12 }
  0x44   :  { %401 = vmatprep.subr.bf16.mxu0 %v570_v0  ;;  %441 = vmatprep.subr.bf16.mxu1 %v570_v0 }
  0x47   :  { %402 = vmatpush3.bf16.msra.mxu0 %v489_v15  ;;  %442 = vmatpush3.bf16.msra.mxu1 %v489_v15 }
  0x48   :  { %407 = vmatprep.subr.bf16.mxu0 %v570_v0  ;;  %447 = vmatprep.subr.bf16.mxu1 %v570_v0 }
  0x4a   :  { %404 = vmatmul.mubr.bf16.vlgmr.msra.gmra.mrb[0].mxu0 %v70_v16 }
  0x4b   :  { %408 = vmatpush3.bf16.msra.mxu0 %v634_v1  ;;  %423 = vmatprep.mubr.msk.bf16.mxu0 %vm571_vm0, %v570_v0 }
  0x4c   :  { %409 = vmatprep.subr.bf16.mxu0 %v570_v0 }
  0x4f   :  { %410 = vmatpush3.bf16.msra.mxu0 %v637_v2 }
  0x50   :  { %411 = vmatprep.subr.bf16.mxu0 %v570_v0 }
  0x53   :  { %412 = vmatpush3.bf16.msra.mxu0 %v643_v3 }
  0x54   :  { %413 = vmatprep.subr.bf16.mxu0 %v570_v0 }
  0x57   :  { %414 = vmatpush3.bf16.msra.mxu0 %v649_v4 }
  0x58   :  { %415 = vmatprep.subr.bf16.mxu0 %v570_v0 }
  0x5b   :  { %416 = vmatpush3.bf16.msra.mxu0 %v655_v5 }
  0x5c   :  { %417 = vmatprep.subr.bf16.mxu0 %v570_v0 }
  0x5f   :  { %418 = vmatpush3.bf16.msra.mxu0 %v661_v9 }
  0x60   :  { %419 = vmatprep.subr.bf16.mxu0 %v570_v0 }
  0x63   :  { %420 = vmatpush3.bf16.msra.mxu0 %v667_v12 }
  0x64   :  { %421 = vmatprep.subr.bf16.mxu0 %v570_v0 }
  0x67   :  { %422 = vmatpush3.bf16.msra.mxu0 %v489_v15 }
  0x6a   :  { %424 = vmatmul.mubr.bf16.vlgmr.msra.gmra.mrb[0].mxu0 %v65_v8 }
 0x13d   :  { %v194_v17 = vpop.f32.mrb[0].mxu0 }
 0x13e   :  { %v201_v18 = vmul.f32 0.03125, %v194_v17  ;;  %v425_v19 = vpop.f32.mrb[1].mxu0 }
 0x13f   :  { %v197_v20 = vpop.f32.mrb[2].mxu0 }
 0x140   :  { %v203_v21 = vsub.f32 %v47_v6, %v201_v18  ;;  %v202_v22 = vmul.f32 0.03125, %v197_v20  ;;  %v426_v23 = vpop.f32.mrb[3].mxu0 }
 0x142   :  { %v204_v24 = vsub.f32 %v48_v7, %v202_v22  ;;  %v205_v25 = vmul.f32 %v203_v21, %v203_v21 }
 0x144   :  { %v206_v26 = vmul.f32 %v204_v24, %v204_v24 }
 0x146   :  { %v207_v27 = vpack.c.bf16 %v206_v26, %v205_v25 }
 0x148   :  { %v208_v28 = vunpack.c.l.bf16 %v207_v27  ;;  %v209_v29 = vunpack.c.h.bf16 %v207_v27 }
 0x14a   :  { %v210_v30 = vsub.f32 %v205_v25, %v208_v28  ;;  %v211_v31 = vsub.f32 %v206_v26, %v209_v29 }
 0x14c   :  { %v212_v32 = vpack.c.bf16 %v211_v31, %v210_v30 }
 0x14e   :  { %444 = vmatmul.mubr.bf16.vlgmr.msra.gmra.mrb[0].mxu1 %v212_v32 }
 0x14f   :  { %448 = vmatpush3.bf16.msra.mxu1 %v634_v1  ;;  %463 = vmatprep.mubr.msk.bf16.mxu1 %vm571_vm0, %v570_v0 }
 0x150   :  { %449 = vmatprep.subr.bf16.mxu1 %v570_v0 }
 0x153   :  { %450 = vmatpush3.bf16.msra.mxu1 %v637_v2 }
 0x154   :  { %451 = vmatprep.subr.bf16.mxu1 %v570_v0 }
 0x157   :  { %452 = vmatpush3.bf16.msra.mxu1 %v643_v3 }
 0x158   :  { %453 = vmatprep.subr.bf16.mxu1 %v570_v0 }
 0x15b   :  { %454 = vmatpush3.bf16.msra.mxu1 %v649_v4 }
 0x15c   :  { %455 = vmatprep.subr.bf16.mxu1 %v570_v0 }
 0x15f   :  { %456 = vmatpush3.bf16.msra.mxu1 %v655_v5 }
 0x160   :  { %457 = vmatprep.subr.bf16.mxu1 %v570_v0 }
 0x163   :  { %458 = vmatpush3.bf16.msra.mxu1 %v661_v9 }
 0x164   :  { %459 = vmatprep.subr.bf16.mxu1 %v570_v0 }
 0x167   :  { %460 = vmatpush3.bf16.msra.mxu1 %v667_v12 }
 0x168   :  { %461 = vmatprep.subr.bf16.mxu1 %v570_v0 }
 0x16b   :  { %462 = vmatpush3.bf16.msra.mxu1 %v489_v15 }
 0x16e   :  { %464 = vmatmul.mubr.bf16.vlgmr.msra.gmra.mrb[0].mxu1 %v207_v27 }
 0x241   :  { %v288_v33 = vpop.f32.mrb[0].mxu1 }
 0x242   :  { %v295_v34 = vmul.f32 0.03125, %v288_v33  ;;  %v465_v35 = vpop.f32.mrb[1].mxu1 }
 0x243   :  { %v291_v36 = vpop.f32.mrb[2].mxu1 }
 0x244   :  { %v297_v37 = vadd.f32 1e-05, %v295_v34  ;;  %v296_v38 = vmul.f32 0.03125, %v291_v36  ;;  %v466_v39 = vpop.f32.mrb[3].mxu1 }
 0x246   :  { %490 = vrsqrt.f32 %v297_v37  ;;  %v298_v40 = vadd.f32 1e-05, %v296_v38 }
 0x248   :  { %492 = vrsqrt.f32 %v298_v40 }
 0x250   :  { %v491_v41 = vpop.eup %490 }
 0x251   :  { %v301_v43 = vmul.f32 %v491_v41, %v203_v21 }
 0x252   :  { %v493_v44 = vpop.eup %492 }
 0x253   :  { %v310_v46 = vmul.f32 %v349_v42, %v301_v43  ;;  %v302_v47 = vmul.f32 %v493_v44, %v204_v24 }
 0x255   :  { %v319_v48 = vadd.f32 %v350_v45, %v310_v46  ;;  %v311_v49 = vmul.f32 %v349_v42, %v302_v47 }
 0x257   :  { %321 = vst [vmem:[#allocation7] sm:$0xff] %v319_v48  ;;  %v320_v50 = vadd.f32 %v350_v45, %v311_v49 }
 0x259   :  { %322 = vst [vmem:[#allocation7 + $0x8] sm:$0xff] %v320_v50 }
 0x25a   :  { %327 = vsyncadd [#allocation4], 192  ;;  %s572_s18 = smov [#allocation7]  }
 0x25b   :  { %s328_s19 = sshll.u32 %s572_s18, 4  ;;  %s329_s19 = int_to_ptr.vmem [resolvable:$true] %s328_s19 }
 0x25c   :  { %s538_s20 = scalar_lea.vmem %s329_s19, 64  ;;  %s542_s2 = scalar_lea.vmem %s329_s19, 256 }
 0x25d   :  { %p539_p2 = scmp.ne.s32.totalorder %s329_s19, %s538_s20  ;;  %p543_p3 = scmp.lt.s32.totalorder %s329_s19, %s329_s19 }
 0x25e   :  { %p544_p4 = scmp.lt.s32.totalorder %s542_s2, %s538_s20 }
 0x260   :  { %p545_p5 = por %p544_p4, %p543_p3 }
 0x262   :  { %p546_p6 = pnand %p545_p5, %p539_p2 }
 0x264   :  { %549 = shalt.err (!%p546_p6)
}
 0x265   :  { %s550_s22 = scalar_lea.hbm %s735_s4, 64 }
 0x266   :  { %p551_p7 = scmp.ne.s32.totalorder %s735_s4, %s550_s22  ;;  %p554_p8 = scmp.lt.u32.totalorder %s550_s22, %s735_s4 }
 0x268   :  { %p556_p9 = pnand %p554_p8, %p551_p7 }
 0x26a   :  { %559 = shalt.err (!%p556_p9)
}
 0x26b   :  { %334 = dma.vmem_to_hbm [thread:$0]  %s329_s19, 64, %s735_s4, [#allocation4], %s567_s26, %s567_s26, %s568_s27  }
 0x26c   :  { %564 = dma.done.wait [#allocation4], 256  }
 0x26d   :  { %565 = vsyncadd [#allocation4], 4294967040 }
 0x26e   :  { %338 = vsyncpa [#allocation3], 1 }
 0x26f   :  { %339 = vsyncpa [#allocation6], 1 }
 0x270   :  { %340 = vsyncpa [#allocation4], 1 }

</bundles_post_ra>
